<compile_context>
chip_gen: v7x
topology: tpu7x:2x2x1
jax: 0.10.0
libtpu: 0.0.40
codegen_flags: <defaults>
</compile_context>

<pallas_src>
import jax
import jax.numpy as jnp
from jax.experimental import pallas as pl
from jax.experimental.pallas import tpu as pltpu

# ---- problem sizes (small, consistent with the module's forward) ----
B = 2          # batch
C = 4          # input channels (EEG channels)
L = 16         # sequence length
K = 3          # conv kernel size (padding=1 -> 'same')
H = 32         # conv output channels / hidden size
S = 8          # spectral feature size
NCLS = 5       # sleep-stage classes
N_MODELS = 3   # ensemble size

CK1 = C * K + 1                 # conv contraction rows (+1 bias row)
MH = N_MODELS * H               # fused conv output lanes (model-major)
HEAD_ROWS = MH + S + 1          # head contraction rows (+1 bias row)
HEAD_OFF = 16                   # bf16 sublane-tile aligned offset inside the slab
SLAB_R = HEAD_OFF + ((HEAD_ROWS + 15) // 16) * 16   # 16 + 112 = 128
SLAB_C = 128                    # lane-padded slab width


def _ensemble_kernel(xcol_ref, spec_ref, wslab_ref, out_ref):
    """Single invocation: fused conv / pool / head for all ensemble members."""
    # Static views into the packed weight slab (no extra DMAs).
    wc = wslab_ref[0:CK1, 0:MH]                              # (C*K+1, M*H) bf16
    wh = wslab_ref[HEAD_OFF:HEAD_OFF + HEAD_ROWS, 0:NCLS]    # (M*H+S+1, NCLS) bf16

    # Fused Conv1d (im2col, bias row folded) for all members:
    # (B*L, C*K+1) @ (C*K+1, M*H) -> (B*L, M*H), f32 accumulation on the MXU.
    conv = jnp.dot(xcol_ref[...], wc, preferred_element_type=jnp.float32)
    conv = jnp.maximum(conv, 0.0)                            # ReLU (f32, VPU)

    # Global mean pool over time as a sublane reduction (no pool-matrix matmul).
    pooled = jnp.sum(conv.reshape(B, L, MH), axis=1) * (1.0 / L)   # (B, M*H) f32

    # Single fused head matmul: [pooled | spectral | 1] @ stacked weights.
    # pooled lanes are model-major, so the contraction sums over the model axis
    # implicitly; the spectral rows are pre-summed over members on the host.
    feat = jnp.concatenate([pooled.astype(jnp.bfloat16), spec_ref[...]], axis=-1)
    logits = jnp.dot(feat, wh, preferred_element_type=jnp.float32)  # (B, NCLS)
    out_ref[...] = logits * (1.0 / N_MODELS)                 # ensemble average


def ensemble_forward(x, spectral, wconv, bconv, wfc, bfc):
    """x: (B, C, L) f32; spectral: (B, S) f32; weights stacked over the model axis."""
    # ---- host-side glue: im2col for the 'same' conv (padding=1) + ones column ----
    x_pad = jnp.pad(x, ((0, 0), (0, 0), (1, 1)))                          # (B, C, L+2)
    x_col = jnp.stack([x_pad[:, :, k:k + L] for k in range(K)], axis=-1)  # (B, C, L, K)
    x_col = jnp.transpose(x_col, (0, 2, 1, 3)).reshape(B * L, C * K)      # (B*L, C*K)
    x_col_aug = jnp.concatenate(
        [x_col, jnp.ones((B * L, 1), x.dtype)], axis=1).astype(jnp.bfloat16)

    spec_aug = jnp.concatenate(
        [spectral, jnp.ones((B, 1), spectral.dtype)], axis=1).astype(jnp.bfloat16)

    # ---- pack ALL weights into one sublane/lane padded bf16 slab ----
    # Conv weights of all members fused along output channels (model-major lanes):
    # (M, H, C, K) -> (C, K, M, H) -> (C*K, M*H); extra row = conv biases.
    wc_all = jnp.transpose(wconv, (2, 3, 0, 1)).reshape(C * K, MH)
    wc_aug = jnp.concatenate([wc_all, bconv.reshape(1, MH)], axis=0)      # (CK1, MH)

    # Head: hidden part stacked model-major (sums over models in one matmul),
    # spectral part and bias summed over members; extra row pairs with the ones col.
    wf_h = wfc[:, :H, :].reshape(MH, NCLS)                                # (M*H, NCLS)
    wf_s = jnp.sum(wfc[:, H:, :], axis=0)                                 # (S, NCLS)
    bf_row = jnp.sum(bfc, axis=0).reshape(1, NCLS)                        # (1, NCLS)
    w_head = jnp.concatenate([wf_h, wf_s, bf_row], axis=0)                # (HEAD_ROWS, NCLS)

    slab = jnp.zeros((SLAB_R, SLAB_C), jnp.float32)
    slab = slab.at[:CK1, :MH].set(wc_aug)
    slab = slab.at[HEAD_OFF:HEAD_OFF + HEAD_ROWS, :NCLS].set(w_head)
    slab = slab.astype(jnp.bfloat16)

    vmem_spec = pl.BlockSpec(memory_space=pltpu.MemorySpace.VMEM)
    return pl.pallas_call(
        _ensemble_kernel,
        out_shape=jax.ShapeDtypeStruct((B, NCLS), jnp.float32),
        in_specs=[vmem_spec] * 3,
        out_specs=vmem_spec,
    )(x_col_aug, spec_aug, slab)


def reference_forward(x, spectral, wconv, bconv, wfc, bfc):
    """Plain-JAX reference of the same ensemble forward (f32 throughout)."""
    outs = []
    for m in range(wconv.shape[0]):
        conv = jax.lax.conv_general_dilated(
            x, wconv[m], window_strides=(1,), padding=((1, 1),),
            dimension_numbers=("NCH", "OIH", "NCH"))                      # (B, H, L)
        conv = jax.nn.relu(conv + bconv[m][None, :, None])
        pooled = jnp.mean(conv, axis=-1)                                  # (B, H)
        feat = jnp.concatenate([pooled, spectral], axis=-1)               # (B, H+S)
        outs.append(feat @ wfc[m] + bfc[m])
    return jnp.mean(jnp.stack(outs), axis=0)


if __name__ == "__main__":
    key = jax.random.PRNGKey(0)
    kx, ks, kw1, kw2 = jax.random.split(key, 4)

    # inputs
    x = jax.random.normal(kx, (B, C, L), dtype=jnp.float32)
    spectral = jax.random.normal(ks, (B, S), dtype=jnp.float32)

    # deterministic "kaiming-like" init (mode='fan_out', relu), biases zero
    std_conv = (2.0 / (H * K)) ** 0.5
    std_fc = (2.0 / NCLS) ** 0.5
    wconv = std_conv * jax.random.normal(kw1, (N_MODELS, H, C, K), dtype=jnp.float32)
    bconv = jnp.zeros((N_MODELS, H), dtype=jnp.float32)
    wfc = std_fc * jax.random.normal(kw2, (N_MODELS, H + S, NCLS), dtype=jnp.float32)
    bfc = jnp.zeros((N_MODELS, NCLS), dtype=jnp.float32)

    # Round params/activations to bf16 "storage" once so the kernel (bf16 MXU
    # inputs, f32 accumulation) and the f32 reference see the same values.
    rnd = lambda a: a.astype(jnp.bfloat16).astype(jnp.float32)
    x, spectral, wconv, wfc = rnd(x), rnd(spectral), rnd(wconv), rnd(wfc)

    out = jax.block_until_ready(ensemble_forward(x, spectral, wconv, bconv, wfc, bfc))
    ref = reference_forward(x, spectral, wconv, bconv, wfc, bfc)

    assert out.shape == (B, NCLS)
    # bf16 matmul inputs (pooled cast, summed spectral weights) -> loose-ish tol.
    assert jnp.allclose(out, ref, atol=2e-2, rtol=2e-2), (out, ref)

    print("KERNEL_OK")
</pallas_src>

<mosaic_0001>
module attributes {stable_mosaic.version = 11 : i64} {
  func.func @_ensemble_kernel(%arg0: memref<32x13xbf16, #tpu.memory_space<vmem>>, %arg1: memref<2x9xbf16, #tpu.memory_space<vmem>>, %arg2: memref<128x128xbf16, #tpu.memory_space<vmem>>, %arg3: memref<2x5xf32, #tpu.memory_space<vmem>>) attributes {dimension_semantics = [], scalar_prefetch = 0 : i64, scratch_operands = 0 : i64, tpu.core_type = #tpu.core_type<tc>} {
    %c0 = arith.constant 0 : index
    %c0_0 = arith.constant 0 : index
    %0 = vector.load %arg2[%c0, %c0_0] : memref<128x128xbf16, #tpu.memory_space<vmem>>, vector<13x96xbf16>
    %c16 = arith.constant 16 : index
    %c0_1 = arith.constant 0 : index
    %1 = vector.load %arg2[%c16, %c0_1] : memref<128x128xbf16, #tpu.memory_space<vmem>>, vector<105x5xbf16>
    %c0_2 = arith.constant 0 : index
    %c0_3 = arith.constant 0 : index
    %2 = vector.load %arg0[%c0_2, %c0_3] : memref<32x13xbf16, #tpu.memory_space<vmem>>, vector<32x13xbf16>
    %cst = arith.constant dense<0.000000e+00> : vector<32x96xf32>
    %3 = tpu.matmul %2, %0, %cst {dimension_numbers = #tpu.dot_dimension_numbers<[1], [0], [0], [1], [0, 0, 1, 1], [], []>} : vector<32x13xbf16>, vector<13x96xbf16>, vector<32x96xf32> -> vector<32x96xf32>
    %cst_4 = arith.constant 0.000000e+00 : f32
    %4 = vector.broadcast %cst_4 : f32 to vector<32x96xf32>
    %5 = arith.maximumf %3, %4 : vector<32x96xf32>
    %6 = vector.shape_cast %5 : vector<32x96xf32> to vector<2x16x96xf32>
    %cst_5 = arith.constant dense<0.000000e+00> : vector<2x96xf32>
    %7 = vector.multi_reduction <add>, %6, %cst_5 [1] : vector<2x16x96xf32> to vector<2x96xf32>
    %cst_6 = arith.constant 6.250000e-02 : f32
    %8 = vector.broadcast %cst_6 : f32 to vector<2x96xf32>
    %9 = arith.mulf %7, %8 : vector<2x96xf32>
    %10 = arith.truncf %9 : vector<2x96xf32> to vector<2x96xbf16>
    %c0_7 = arith.constant 0 : index
    %c0_8 = arith.constant 0 : index
    %11 = vector.load %arg1[%c0_7, %c0_8] : memref<2x9xbf16, #tpu.memory_space<vmem>>, vector<2x9xbf16>
    %12 = tpu.concatenate %10, %11 in 1 : vector<2x96xbf16>, vector<2x9xbf16> -> vector<2x105xbf16>
    %cst_9 = arith.constant dense<0.000000e+00> : vector<2x5xf32>
    %13 = tpu.matmul %12, %1, %cst_9 {dimension_numbers = #tpu.dot_dimension_numbers<[1], [0], [0], [1], [0, 0, 1, 1], [], []>} : vector<2x105xbf16>, vector<105x5xbf16>, vector<2x5xf32> -> vector<2x5xf32>
    %cst_10 = arith.constant 0.333333343 : f32
    %14 = vector.broadcast %cst_10 : f32 to vector<2x5xf32>
    %15 = arith.mulf %13, %14 : vector<2x5xf32>
    %c0_11 = arith.constant 0 : index
    %c0_12 = arith.constant 0 : index
    %16 = vector.load %arg3[%c0_11, %c0_12] : memref<2x5xf32, #tpu.memory_space<vmem>>, vector<2x5xf32>
    tpu.vector_store %arg3[%c0_11, %c0_12], %15 {strides = array<i32>} : memref<2x5xf32, #tpu.memory_space<vmem>>, vector<2x5xf32>,
    return
  }
}

</mosaic_0001>

<bundles_post_ra>
// kernel: tpu_custom_call.1
= control target key start
LH: loop header
LB: loop body
LE: loop exit
PB: predicated region body
PF: predicated region fallthrough
CT: control target
= control target key end

     0   :  { %8 = vsyncpa [#allocation3], 0  ;;  %s475_s0 = inlined_call_operand.vmem [shape: bf16[32,13], index: 0, kind: input, shape index: {}]   ;;  %s476_s1 = inlined_call_operand.vmem [shape: bf16[2,9], index: 1, kind: input, shape index: {}]   ;;  %s477_s2 = inlined_call_operand.hbm [shape: bf16[128,128], index: 2, kind: input, shape index: {}]   ;;  %s478_s3 = inlined_call_operand.hbm [shape: f32[2,5], index: 3, kind: output, shape index: {}]  }
   0x1   :  { %9 = vsyncpa [#allocation4], 0  ;;  %s408_s12 = smov [#allocation2]   ;;  %s360_s16 = scalar_lea.hbm %s477_s2, 1024 }
   0x2   :  { %s19_s13 = sshll.u32 %s408_s12, 4  ;;  %p361_p0 = scmp.ne.s32.totalorder %s477_s2, %s360_s16  ;;  %s20_s13 = int_to_ptr.vmem [resolvable:$true] %s19_s13 }
   0x3   :  { %p364_p1 = scmp.lt.u32.totalorder %s360_s16, %s477_s2 }
   0x5   :  { %p366_p2 = pnand %p364_p1, %p361_p0 }
   0x7   :  { %369 = shalt.err (!%p366_p2)
}
   0x8   :  { %s370_s21 = scalar_lea.vmem %s20_s13, 1024  ;;  %p375_p4 = scmp.lt.s32.totalorder %s20_s13, %s20_s13 }
   0x9   :  { %p371_p3 = scmp.ne.s32.totalorder %s20_s13, %s370_s21  ;;  %p376_p5 = scmp.lt.s32.totalorder %s370_s21, %s370_s21 }
   0xb   :  { %p377_p6 = por %p376_p5, %p375_p4 }
   0xd   :  { %p378_p7 = pnand %p377_p6, %p371_p3 }
   0xf   :  { %381 = shalt.err (!%p378_p7)
}
  0x10   :  { %s409_s22 = smov 64   ;;  %s410_s23 = smov 4  }
  0x11   :  { %25 = dma.hbm_to_vmem [thread:$0]  %s477_s2, 1024, %s20_s13, [#allocation3], %s409_s22, %s409_s22, %s410_s23  }
  0x12   :  { %404 = dma.done.wait [#allocation3], 1024  }
  0x13   :  { %405 = vsyncadd [#allocation3], 4294966272  ;;  %vm72_vm0 = vcmask 1045504   ;;  %v411_v0 = vmov 1966171168   ;;  %v174_v2 = vlaneseq  ;;  %vm73_vm1 = vcmask 1046528  }
  0x14   :  { %v172_v1 = vunpack.c.l.s4 %v411_v0  ;;  %v412_v3 = vmov 65535   ;;  %vm65_vm2 = vcmask 105472   ;;  %v350_v8 = vld [vmem:[#allocation2] sm:$0x7f]   ;;  %v351_v10 = vld [vmem:[%s475_s0] sm:$0xff]   ;;  %v352_v12 = vld [vmem:[%s475_s0 + $0x8] sm:$0xff]  }
  0x15   :  { %v74_v4 = vsel %vm72_vm0, 4294967295, %v412_v3  ;;  %v175_v6 = vshrl.u32 %v174_v2, 7  ;;  %319 = vmatprep.mubr.msk.bf16.mxu0 %vm65_vm2, %v351_v10  ;;  %v297_v13 = vld.sshfl [vmem:[%s476_s1] sm:$0x1 pattern:$0x75316420] }
  0x16   :  { %v173_v5 = vunpack.c.0.s8 %v172_v1  ;;  %v75_v7 = vsel %vm73_vm1, %v74_v4, 0  ;;  %s413_s4 = smov 96   ;;  %v353_v15 = vld [vmem:[#allocation2 + $0x8] sm:$0xff]   ;;  %v414_v16 = vmov 0.0   ;;  %v354_v17 = vld [vmem:[#allocation2 + $0x10] sm:$0xff]   ;;  %v355_v18 = vld [vmem:[#allocation2 + $0x18] sm:$0xff]  }
  0x17   :  { %v77_v11 = vand.u32 %v350_v8, %v75_v7  ;;  %323 = vmatprep.subr.bf16.mxu1 %v414_v16  ;;  %v356_v19 = vld [vmem:[#allocation2 + $0x20] sm:$0xff]   ;;  %v357_v20 = vld [vmem:[#allocation2 + $0x28] sm:$0xff]   ;;  %vm227_vm3 = vcmask 1043456   ;;  %v358_v22 = vld [vmem:[#allocation2 + $0x30] sm:$0xff]   ;;  %vm228_vm4 = vcmask 1044480   ;;  %vm415_vm5 = vmmov 0  }
  0x18   :  { %v176_v9 = vsub.s32 %v173_v5, %v175_v6  ;;  %324 = vmatpush3.bf16.msra.mxu1 %v353_v15  ;;  %v229_v21 = vsel %vm227_vm3, 4294967295, %v412_v3  ;;  %v359_v23 = vld [vmem:[#allocation2 + $0x38] sm:$0x1f]   ;;  %337 = vmatprep.mubr.msk.bf16.mxu1 %vm415_vm5, %v414_v16  ;;  %vm132_vm6 = vcmask 785408   ;;  %vm160_vm7 = vcmask 1041409   ;;  %s416_s0 = smov [#allocation5]  }
  0x19   :  { %317 = vmatprep.subr.bf16.mxu0 %v77_v11  ;;  %325 = vmatprep.subr.bf16.mxu1 %v414_v16  ;;  %v230_v24 = vsel %vm228_vm4, %v229_v21, 0  ;;  %vm224_vm8 = vcmask 859136   ;;  %s283_s1 = sshll.u32 %s416_s0, 4  ;;  %vm275_vm9 = vcmask 33792   ;;  %s284_s1 = int_to_ptr.vmem [resolvable:$true] %s283_s1 }
  0x1a   :  { %v177_v14 = vrot.slane %v297_v13, %v176_v9  ;;  %318 = vmatpush3.bf16.msra.mxu0 %v77_v11  ;;  %v232_v25 = vand.u32 %v359_v23, %v230_v24  ;;  %s382_s5 = scalar_lea.vmem %s284_s1, 32  ;;  %p387_p9 = scmp.lt.s32.totalorder %s284_s1, %s284_s1 }
  0x1b   :  { %p383_p8 = scmp.ne.s32.totalorder %s284_s1, %s382_s5  ;;  %p388_p10 = scmp.lt.s32.totalorder %s382_s5, %s382_s5 }
  0x1c   :  { %178 = vrot.lane.b32.xlu0 %v177_v14, %s413_s4  ;;  %326 = vmatpush3.bf16.msra.mxu1 %v354_v17 }
  0x1d   :  { %320 = vmatmul.mubr.msk.bf16.vlgmr.msra.gmra.mrb[0].mxu0 %vm65_vm2, %v352_v12  ;;  %327 = vmatprep.subr.bf16.mxu1 %v414_v16  ;;  %p389_p11 = por %p388_p10, %p387_p9 }
  0x1f   :  { %p390_p12 = pnand %p389_p11, %p383_p8 }
  0x20   :  { %328 = vmatpush3.bf16.msra.mxu1 %v355_v18 }
  0x21   :  { %329 = vmatprep.subr.bf16.mxu1 %v414_v16 }
  0x24   :  { %330 = vmatpush3.bf16.msra.mxu1 %v356_v19 }
  0x25   :  { %331 = vmatprep.subr.bf16.mxu1 %v414_v16 }
  0x28   :  { %332 = vmatpush3.bf16.msra.mxu1 %v357_v20 }
  0x29   :  { %333 = vmatprep.subr.bf16.mxu1 %v414_v16 }
  0x2c   :  { %334 = vmatpush3.bf16.msra.mxu1 %v358_v22 }
  0x2d   :  { %335 = vmatprep.subr.bf16.mxu1 %v414_v16 }
  0x30   :  { %336 = vmatpush3.bf16.msra.mxu1 %v232_v25 }
  0x8e   :  { %v179_v59 = vpop.permute.xlu0 %178 }
  0xf0   :  { %v321_v26 = vpop.f32.mrb[0].mxu0 }
  0xf1   :  { %v130_v27 = vmax.f32 %v321_v26, 0.0  ;;  %v113_v28 = vpop.f32.mrb[1].mxu0 }
  0xf2   :  { %v128_v29 = vmax.f32 %v113_v28, 0.0  ;;  %v322_v30 = vpop.f32.mrb[2].mxu0 }
  0xf3   :  { %v131_v31 = vmax.f32 %v322_v30, 0.0  ;;  %v116_v32 = vpop.f32.mrb[3].mxu0  ;;  %v142_v34 = vsel %vm132_vm6, %v130_v27, 0.0 }
  0xf4   :  { %v129_v33 = vmax.f32 %v116_v32, 0.0  ;;  %v133_v36 = vsel %vm132_vm6, %v128_v29, 0.0 }
  0xf5   :  { %v143_v35 = vsel %vm132_vm6, %v131_v31, 0.0 }
  0xf6   :  { %v144_v37 = vadd.f32 %v143_v35, %v142_v34  ;;  %v134_v38 = vsel %vm132_vm6, %v129_v33, 0.0 }
  0xf7   :  { %v135_v39 = vadd.f32 %v134_v38, %v133_v36 }
  0xf8   :  { %v145_v40 = vrot.slane %v144_v37, 4 }
  0xf9   :  { %v136_v41 = vrot.slane %v135_v39, 4 }
  0xfa   :  { %v146_v42 = vadd.f32 %v145_v40, %v144_v37 }
  0xfb   :  { %v137_v43 = vadd.f32 %v136_v41, %v135_v39 }
  0xfc   :  { %v147_v44 = vrot.slane %v146_v42, 2 }
  0xfd   :  { %v138_v45 = vrot.slane %v137_v43, 2 }
  0xfe   :  { %v148_v46 = vadd.f32 %v147_v44, %v146_v42 }
  0xff   :  { %v139_v47 = vadd.f32 %v138_v45, %v137_v43 }
 0x100   :  { %v149_v48 = vrot.slane %v148_v46, 1 }
 0x101   :  { %v140_v49 = vrot.slane %v139_v47, 1 }
 0x102   :  { %v150_v50 = vadd.f32 %v149_v48, %v148_v46 }
 0x103   :  { %v141_v51 = vadd.f32 %v140_v49, %v139_v47 }
 0x104   :  { %v152_v52 = vmul.f32 0.0625, %v150_v50 }
 0x105   :  { %v151_v53 = vmul.f32 0.0625, %v141_v51 }
 0x106   :  { %v154_v54 = vpack.c.bf16 %v152_v52, %v152_v52 }
 0x107   :  { %v153_v55 = vpack.c.bf16 %v151_v53, %v151_v53 }
 0x108   :  { %v159_v56 = vunpack.c.l.b16 %v154_v54 }
 0x109   :  { %v158_v57 = vunpack.c.l.b16 %v153_v55 }
 0x10b   :  { %v161_v58 = vsel %vm160_vm7, %v159_v56, %v158_v57 }
 0x10c   :  { %v162_v60 = vpack.c.b16 %v161_v58, %v161_v58 }
 0x10e   :  { %v182_v61 = vsel %vm132_vm6, %v162_v60, %v179_v59 }
 0x10f   :  { %338 = vmatmul.mubr.msk.bf16.vlgmr.msra.gmra.mrb[0].mxu1 %vm224_vm8, %v182_v61 }
 0x1e2   :  { %v268_v62 = vpop.f32.mrb[0].mxu1 }
 0x1e3   :  { %v274_v63 = vmul.f32 0.33333334, %v268_v62  ;;  %v339_v0 = vpop.f32.mrb[1].mxu1 }
 0x1e4   :  { %v271_v1 = vpop.f32.mrb[2].mxu1 }
 0x1e5   :  { %v340_v2 = vpop.f32.mrb[3].mxu1  ;;  %276 = vst.msk [vmem:[#allocation5] sm:$0x3] %vm275_vm9, %v274_v63 }
 0x1e6   :  { %393 = shalt.err (!%p390_p12)
}
 0x1e7   :  { %s394_s8 = scalar_lea.hbm %s478_s3, 32 }
 0x1e8   :  { %p395_p13 = scmp.ne.s32.totalorder %s478_s3, %s394_s8  ;;  %p398_p0 = scmp.lt.u32.totalorder %s394_s8, %s478_s3 }
 0x1ea   :  { %p400_p1 = pnand %p398_p0, %p395_p13 }
 0x1ec   :  { %403 = shalt.err (!%p400_p1)
}
 0x1ed   :  { %286 = dma.vmem_to_hbm [thread:$0]  %s284_s1, 32, %s478_s3, [#allocation4]  }
 0x1ee   :  { %406 = dma.done.wait [#allocation4], 32  }
 0x1ef   :  { %407 = vsyncadd [#allocation4], 4294967264 }
 0x1f0   :  { %290 = vsyncpa [#allocation3], 1 }
 0x1f1   :  { %291 = vsyncpa [#allocation4], 1 }

</bundles_post_ra>
